<compile_context>
chip_gen: v7x
topology: tpu7x:2x2x1
jax: 0.10.0
libtpu: 0.0.40
codegen_flags: <defaults>
</compile_context>

<pallas_src>
import functools
import math

import jax
import jax.numpy as jnp
from jax.experimental import pallas as pl
from jax.experimental.pallas import tpu as pltpu


def _round_up(x: int, m: int) -> int:
    return (x + m - 1) // m * m


def _divisors(n: int):
    ds = []
    i = 1
    while i * i <= n:
        if n % i == 0:
            ds.append(i)
            ds.append(n // i)
        i += 1
    return ds


def _mean_pool_kernel(x_ref, o_ref, *, inv_n, n_rem):
    """Accumulate node-axis sums of one (tb, tn, tf) block directly into o_ref (f32)."""
    nb = pl.program_id(2)                       # node axis = last ("arbitrary") grid axis
    last = pl.num_programs(2) - 1

    @pl.when(nb == 0)
    def _init():
        o_ref[...] = jnp.zeros_like(o_ref)

    if n_rem == 0:
        # Steady state: pure load + f32 add, no masking.
        o_ref[...] += jnp.sum(x_ref[...].astype(jnp.float32), axis=1)
    else:
        @pl.when(nb != last)
        def _acc_full():
            o_ref[...] += jnp.sum(x_ref[...].astype(jnp.float32), axis=1)

        @pl.when(nb == last)
        def _acc_tail():
            # Static tail slice: only the n_rem valid node rows of the partial
            # last node tile are loaded/summed (no iota / where mask).
            o_ref[...] += jnp.sum(x_ref[:, :n_rem, :].astype(jnp.float32), axis=1)

    @pl.when(nb == last)
    def _finalize():
        o_ref[...] = o_ref[...] * inv_n


def pooling_layer(node_fea: jax.Array, *, block_budget_bytes: int | None = None) -> jax.Array:
    """Mean over dim=1 of a [B, N, F] array, computed in a Pallas TPU kernel."""
    B, N, F = node_fea.shape
    dtype = node_fea.dtype
    itemsize = jnp.dtype(dtype).itemsize
    sub_q = max(8, 32 // itemsize)          # sublane quantum: f32 -> 8, bf16 -> 16, int8 -> 32

    # ---- Lane-dense folding of node rows into the feature axis (free, row-major). ----
    k = 1
    if F % 128 != 0:
        k_exact = 128 // math.gcd(F, 128)   # smallest k with (k*F) % 128 == 0
        if N % k_exact == 0:
            k = k_exact
        elif F < 128:
            # Fallback: smallest divisor of N making the folded width >= 128 lanes.
            for cand in range(2, min(N, 512) + 1):
                if N % cand == 0 and cand * F >= 128:
                    k = cand
                    break
    n2, f2 = N // k, F * k
    x = node_fea.reshape(B, n2, f2) if k > 1 else node_fea
    f2_pad = _round_up(f2, 128)

    # ---- Generation-aware VMEM budget. ----
    try:
        vmem_cap = int(pltpu.get_tpu_info().vmem_capacity_bytes)
    except Exception:
        vmem_cap = 128 * 1024 * 1024        # conservative default (v5e/v6e)
    vmem_limit = min((vmem_cap * 3) // 4, 64 * 1024 * 1024)   # 64 MiB v5e/v6e, 48 MiB v7x
    headroom = 6 * 1024 * 1024              # compiler-internal scratch / misc
    avail = max(vmem_limit - headroom, 8 * 1024 * 1024)       # budget for 2x(in + out) blocks
    if block_budget_bytes is not None:      # test hook to force node-axis tiling
        avail = block_budget_bytes

    # ---- Optional feature split: gives the v7x megacore >= 2 parallel steps
    #      when the batch axis cannot (small B); harmless on v5e/v6e. ----
    tf = f2
    if B < 16 and f2_pad >= 256:
        tf_half = _round_up(pl.cdiv(f2, 2), 128)
        if tf_half < f2:
            tf = tf_half
    nb_f = pl.cdiv(f2, tf)
    tf_pad = tf if tf < f2 else f2_pad      # split blocks are already multiples of 128

    def _fits(tb: int, tn: int) -> bool:
        in_blk = tb * _round_up(tn, sub_q) * tf_pad * itemsize
        out_blk = _round_up(tb, 8) * tf_pad * 4
        return 2 * (in_blk + out_blk) <= avail

    # ---- Tile selection (layout- and double-buffer-aware). ----
    if _fits(min(B, 8), n2):
        # Whole node slab per step; pack as many batch rows as fit.
        tn = n2
        per_row = 2 * (_round_up(tn, sub_q) * tf_pad * itemsize + tf_pad * 4)
        max_tb = max(1, avail // per_row)
        if B <= 8 or max_tb >= B:
            tb = B
        else:
            tb = min(B, max(8, (max_tb // 8) * 8))
        # v7x: make sure the batch ("parallel") axis has >= 2 steps for 2 TCs.
        if tb == B and B >= 16:
            tb = _round_up(pl.cdiv(B, 2), 8)
        n_rem = 0
    else:
        # Node slab too large: stream the node axis through fixed tiles.
        tb = min(B, 8)
        out_blk = _round_up(tb, 8) * tf_pad * 4
        in_budget = max(0, avail - 2 * out_blk) // 2
        denom = tb * tf_pad * itemsize
        max_tn = max(sub_q, in_budget // denom)
        if max_tn >= n2:
            tn = n2
        else:
            cand = [d for d in _divisors(n2) if d <= max_tn and d % sub_q == 0]
            if cand:
                tn = max(cand)              # exact divisor: no tail path compiled at all
            else:
                tn = min(n2, max(sub_q, (max_tn // sub_q) * sub_q))
        n_rem = n2 % tn

    grid = (pl.cdiv(B, tb), nb_f, pl.cdiv(n2, tn))

    kernel = functools.partial(_mean_pool_kernel, inv_n=float(1.0 / N), n_rem=n_rem)

    partial_means = pl.pallas_call(
        kernel,
        out_shape=jax.ShapeDtypeStruct((B, f2), jnp.float32),
        grid_spec=pltpu.PrefetchScalarGridSpec(
            num_scalar_prefetch=0,
            grid=grid,
            in_specs=[pl.BlockSpec((tb, tn, tf), lambda b, f, n: (b, n, f))],
            out_specs=pl.BlockSpec((tb, tf), lambda b, f, n: (b, f)),
        ),
        compiler_params=pltpu.CompilerParams(
            dimension_semantics=("parallel", "parallel", "arbitrary"),
            vmem_limit_bytes=int(vmem_limit),
        ),
    )(x)

    # Tiny k-way fold of the lane-folded f32 partial means + cast back to input dtype.
    pooled = partial_means.reshape(B, k, F).sum(axis=1) if k > 1 else partial_means
    return pooled.astype(dtype)


if __name__ == "__main__":
    key = jax.random.PRNGKey(0)
    keys = jax.random.split(key, 6)

    def check(x, **kw):
        out = jax.block_until_ready(pooling_layer(x, **kw))
        ref = jnp.mean(x.astype(jnp.float32), axis=1).astype(x.dtype)
        assert out.shape == ref.shape, (out.shape, ref.shape)
        assert jnp.allclose(out.astype(jnp.float32), ref.astype(jnp.float32),
                            atol=1e-4, rtol=1e-4)

    # Primary shape (batch=2, num_nodes=8, feature_dim=32): exact fold k=4.
    check(jax.random.normal(keys[0], (2, 8, 32), dtype=jnp.float32))

    # F=20 (128 % 20 != 0): generalized fallback fold path.
    check(jax.random.normal(keys[1], (3, 10, 20), dtype=jnp.float32))

    # Exact fold k=2.
    check(jax.random.normal(keys[2], (2, 16, 64), dtype=jnp.float32))

    # Feature-axis split (f2 = 256 -> two 128-lane blocks).
    check(jax.random.normal(keys[3], (2, 16, 256), dtype=jnp.float32))

    # Feature-axis split with a partial last feature block (f2 = 384, tf = 256).
    check(jax.random.normal(keys[4], (2, 16, 384), dtype=jnp.float32))

    # Forced node-axis tiling with a remainder tail (tn=8, n_rem=2) via test hook.
    check(jax.random.normal(keys[5], (2, 40, 32), dtype=jnp.float32),
          block_budget_bytes=24576)

    print("KERNEL_OK")
</pallas_src>

<mosaic_0001>
module attributes {stable_mosaic.version = 11 : i64} {
  func.func @_mean_pool_kernel(%arg0: i32, %arg1: i32, %arg2: i32, %arg3: memref<2x2x128xf32, #tpu.memory_space<vmem>>, %arg4: memref<2x128xf32, #tpu.memory_space<vmem>>) attributes {dimension_semantics = [#tpu.dimension_semantics<parallel>, #tpu.dimension_semantics<parallel>, #tpu.dimension_semantics<arbitrary>], iteration_bounds = array<i64: 1, 1, 1>, scalar_prefetch = 0 : i64, scratch_operands = 0 : i64, tpu.core_type = #tpu.core_type<tc>, window_params = [{transform_indices = @transform_0, window_bounds = array<i64: 2, 2, 128>}, {transform_indices = @transform_1, window_bounds = array<i64: 2, 128>}]} {
    %c0_i32 = arith.constant 0 : i32
    %0 = arith.cmpi eq, %arg2, %c0_i32 : i32
    %1 = arith.extui %0 : i1 to i32
    %c0_i32_0 = arith.constant 0 : i32
    %2 = arith.cmpi ne, %1, %c0_i32_0 : i32
    scf.if %2 {
      %cst_9 = arith.constant 0.000000e+00 : f32
      %11 = vector.broadcast %cst_9 : f32 to vector<2x128xf32>
      %c0_10 = arith.constant 0 : index
      %c0_11 = arith.constant 0 : index
      %12 = vector.load %arg4[%c0_10, %c0_11] : memref<2x128xf32, #tpu.memory_space<vmem>>, vector<2x128xf32>
      tpu.vector_store %arg4[%c0_10, %c0_11], %11 {strides = array<i32>} : memref<2x128xf32, #tpu.memory_space<vmem>>, vector<2x128xf32>,
    } else {
    }
    %c0 = arith.constant 0 : index
    %c0_1 = arith.constant 0 : index
    %3 = vector.load %arg4[%c0, %c0_1] : memref<2x128xf32, #tpu.memory_space<vmem>>, vector<2x128xf32>
    %c0_2 = arith.constant 0 : index
    %c0_3 = arith.constant 0 : index
    %c0_4 = arith.constant 0 : index
    %4 = vector.load %arg3[%c0_2, %c0_3, %c0_4] : memref<2x2x128xf32, #tpu.memory_space<vmem>>, vector<2x2x128xf32>
    %cst = arith.constant dense<0.000000e+00> : vector<2x128xf32>
    %5 = vector.multi_reduction <add>, %4, %cst [1] : vector<2x2x128xf32> to vector<2x128xf32>
    %6 = arith.addf %3, %5 : vector<2x128xf32>
    %c0_5 = arith.constant 0 : index
    %c0_6 = arith.constant 0 : index
    %7 = vector.load %arg4[%c0_5, %c0_6] : memref<2x128xf32, #tpu.memory_space<vmem>>, vector<2x128xf32>
    tpu.vector_store %arg4[%c0_5, %c0_6], %6 {strides = array<i32>} : memref<2x128xf32, #tpu.memory_space<vmem>>, vector<2x128xf32>,
    %c0_i32_7 = arith.constant 0 : i32
    %8 = arith.cmpi eq, %arg2, %c0_i32_7 : i32
    %9 = arith.extui %8 : i1 to i32
    %c0_i32_8 = arith.constant 0 : i32
    %10 = arith.cmpi ne, %9, %c0_i32_8 : i32
    scf.if %10 {
      %c0_9 = arith.constant 0 : index
      %c0_10 = arith.constant 0 : index
      %11 = vector.load %arg4[%c0_9, %c0_10] : memref<2x128xf32, #tpu.memory_space<vmem>>, vector<2x128xf32>
      %cst_11 = arith.constant 1.250000e-01 : f32
      %12 = vector.broadcast %cst_11 : f32 to vector<2x128xf32>
      %13 = arith.mulf %11, %12 : vector<2x128xf32>
      %c0_12 = arith.constant 0 : index
      %c0_13 = arith.constant 0 : index
      %14 = vector.load %arg4[%c0_12, %c0_13] : memref<2x128xf32, #tpu.memory_space<vmem>>, vector<2x128xf32>
      tpu.vector_store %arg4[%c0_12, %c0_13], %13 {strides = array<i32>} : memref<2x128xf32, #tpu.memory_space<vmem>>, vector<2x128xf32>,
    } else {
    }
    return
  }
  func.func @transform_0(%arg0: i32, %arg1: i32, %arg2: i32) -> (i32, i32, i32) {
    %c0_i32 = arith.constant 0 : i32
    return %arg0, %arg2, %arg1 : i32, i32, i32
  }
  func.func @transform_1(%arg0: i32, %arg1: i32, %arg2: i32) -> (i32, i32) {
    %c0_i32 = arith.constant 0 : i32
    return %arg0, %arg1 : i32, i32
  }
}

</mosaic_0001>

<bundles_post_ra>
// kernel: tpu_custom_call.1
= control target key start
LH: loop header
LB: loop body
LE: loop exit
PB: predicated region body
PF: predicated region fallthrough
CT: control target
= control target key end

     0   :  { %6 = vsyncpa [#allocation3], 0  ;;  %s166_s0 = inlined_call_operand.hbm [shape: f32[2,2,128], index: 0, kind: input, shape index: {}]   ;;  %s167_s1 = inlined_call_operand.hbm [shape: f32[2,128], index: 1, kind: output, shape index: {}]  }
   0x1   :  { %7 = vsyncpa [#allocation4], 0  ;;  %s127_s6 = smov [#allocation2]   ;;  %s79_s10 = scalar_lea.hbm %s166_s0, 64 }
   0x2   :  { %s13_s7 = sshll.u32 %s127_s6, 4  ;;  %p80_p0 = scmp.ne.s32.totalorder %s166_s0, %s79_s10  ;;  %s14_s7 = int_to_ptr.vmem [resolvable:$true] %s13_s7 }
   0x3   :  { %p83_p1 = scmp.lt.u32.totalorder %s79_s10, %s166_s0 }
   0x5   :  { %p85_p2 = pnand %p83_p1, %p80_p0 }
   0x7   :  { %88 = shalt.err (!%p85_p2)
}
   0x8   :  { %s89_s15 = scalar_lea.vmem %s14_s7, 64  ;;  %p94_p4 = scmp.lt.s32.totalorder %s14_s7, %s14_s7 }
   0x9   :  { %p90_p3 = scmp.ne.s32.totalorder %s14_s7, %s89_s15  ;;  %p95_p5 = scmp.lt.s32.totalorder %s89_s15, %s89_s15 }
   0xb   :  { %p96_p6 = por %p95_p5, %p94_p4 }
   0xd   :  { %p97_p7 = pnand %p96_p6, %p90_p3 }
   0xf   :  { %100 = shalt.err (!%p97_p7)
}
  0x10   :  { %s128_s16 = smov 32   ;;  %s129_s17 = smov 2  }
  0x11   :  { %19 = dma.hbm_to_vmem [thread:$0]  %s166_s0, 64, %s14_s7, [#allocation3], %s128_s16, %s128_s16, %s129_s17  }
  0x12   :  { %123 = dma.done.wait [#allocation3], 64  }
  0x13   :  { %124 = vsyncadd [#allocation3], 4294967232  ;;  %v130_v0 = vmov 0.0   ;;  %vm31_vm0 = vcmask 1041408   ;;  %v29_v1 = vld [vmem:[#allocation2] sm:$0x3] }
  0x14   :  { %27 = vst [vmem:[#allocation5] sm:$0x3] %v130_v0  ;;  %v30_v2 = vld [vmem:[#allocation2 + $0x2] sm:$0x3]  ;;  %v32_v3 = vsel %vm31_vm0, %v29_v1, 0.0  ;;  %vm48_vm1 = vcmask 1041409  }
  0x15   :  { %v39_v4 = vsel %vm31_vm0, %v30_v2, 0.0  ;;  %v33_v5 = vrot.slane %v32_v3, 4  ;;  %s131_s0 = smov [#allocation5]  }
  0x16   :  { %v40_v6 = vrot.slane %v39_v4, 4  ;;  %s65_s20 = sshll.u32 %s131_s0, 4  ;;  %s66_s20 = int_to_ptr.vmem [resolvable:$true] %s65_s20 }
  0x17   :  { %v34_v7 = vadd.f32 %v33_v5, %v32_v3  ;;  %s101_s21 = scalar_lea.vmem %s66_s20, 32  ;;  %p106_p9 = scmp.lt.s32.totalorder %s66_s20, %s66_s20 }
  0x18   :  { %v41_v8 = vadd.f32 %v40_v6, %v39_v4  ;;  %p102_p8 = scmp.ne.s32.totalorder %s66_s20, %s101_s21  ;;  %p107_p10 = scmp.lt.s32.totalorder %s101_s21, %s101_s21 }
  0x19   :  { %v35_v9 = vrot.slane %v34_v7, 2 }
  0x1a   :  { %v42_v10 = vrot.slane %v41_v8, 2  ;;  %p108_p11 = por %p107_p10, %p106_p9 }
  0x1b   :  { %v36_v11 = vadd.f32 %v35_v9, %v34_v7  ;;  %v28_v15 = vld [vmem:[#allocation5] sm:$0x3] }
  0x1c   :  { %v43_v12 = vadd.f32 %v42_v10, %v41_v8  ;;  %p109_p12 = pnand %p108_p11, %p102_p8 }
  0x1d   :  { %v37_v13 = vrot.slane %v36_v11, 1 }
  0x1e   :  { %v44_v14 = vrot.slane %v43_v12, 1 }
  0x1f   :  { %v38_v16 = vadd.f32 %v37_v13, %v36_v11 }
  0x20   :  { %v45_v17 = vadd.f32 %v44_v14, %v43_v12 }
  0x22   :  { %v49_v18 = vsel %vm48_vm1, %v45_v17, %v38_v16 }
  0x23   :  { %v51_v19 = vadd.f32 %v49_v18, %v28_v15 }
  0x25   :  { %52 = vst [vmem:[#allocation5] sm:$0x3] %v51_v19 }
  0x2c   :  { %v56_v20 = vld [vmem:[#allocation5] sm:$0x3] }
  0x2d   :  { %v57_v21 = vmul.f32 0.125, %v56_v20 }
  0x2f   :  { %58 = vst [vmem:[#allocation5] sm:$0x3] %v57_v21 }
  0x30   :  { %112 = shalt.err (!%p109_p12)
}
  0x31   :  { %s113_s24 = scalar_lea.hbm %s167_s1, 32 }
  0x32   :  { %p114_p13 = scmp.ne.s32.totalorder %s167_s1, %s113_s24  ;;  %p117_p0 = scmp.lt.u32.totalorder %s113_s24, %s167_s1 }
  0x34   :  { %p119_p1 = pnand %p117_p0, %p114_p13 }
  0x36   :  { %122 = shalt.err (!%p119_p1)
}
  0x37   :  { %68 = dma.vmem_to_hbm [thread:$0]  %s66_s20, 32, %s167_s1, [#allocation4]  }
  0x38   :  { %125 = dma.done.wait [#allocation4], 32  }
  0x39   :  { %126 = vsyncadd [#allocation4], 4294967264 }
  0x3a   :  { %72 = vsyncpa [#allocation3], 1 }
  0x3b   :  { %73 = vsyncpa [#allocation4], 1 }

</bundles_post_ra>
